<compile_context>
chip_gen: v5e
topology: v5e:2x2
jax: 0.10.0
libtpu: 0.0.40
codegen_flags: <defaults>
</compile_context>

<pallas_src>
import jax
import jax.numpy as jnp
from jax.experimental import pallas as pl
from jax.experimental.pallas import tpu as pltpu

OUTPUT_SIZE = 3
OUT_PAD = 128   # lane-dense output width; sliced back to OUTPUT_SIZE in wrapper
SUBLANE = 8     # pad batch to a multiple of this for dense sublane tiles


def gaze_lstm_kernel(x_ref, h0_ref, c0_ref,
                     wih_ref, whh_ref, b_ref,
                     w1_ref, b1_ref, w2_ref, b2_ref,
                     y_ref, hn_ref, cn_ref):
    Bp, H = h0_ref.shape
    TB = x_ref.shape[0]
    T = TB // Bp

    # Load weights / biases exactly once (no per-iteration re-broadcast).
    wih = wih_ref[...]
    whh = whh_ref[...]
    bias = b_ref[...]
    w1 = w1_ref[...]
    b1 = b1_ref[...]
    w2 = w2_ref[...]
    b2 = b2_ref[...]

    # Hoisted input projection for all timesteps, kept in vregs:
    # (T*Bp, D) @ (D, 4H) + b.  For the target shapes this is only a couple
    # of vregs, so no VMEM scratch round-trip on the serial chain.
    pg = jnp.dot(x_ref[...], wih, preferred_element_type=jnp.float32) + bias

    # TODO(synk): for very long T, switch to lax.fori_loop with a bounded
    # unroll factor (e.g. 8) to limit code size / vreg live ranges.
    h = h0_ref[...]
    c = c0_ref[...]
    hs = []
    for t in range(T):
        # gates = pre_gates[t] + h_{t-1} @ W_hh^T        -> (Bp, 4H)
        # Static slice of the vreg-resident pre-gates (free under unrolling).
        gates = pg[t * Bp:(t + 1) * Bp, :] + jnp.dot(
            h, whh, preferred_element_type=jnp.float32)
        # Full-vreg EUP passes; slice afterwards.  PyTorch gate order: i,f,g,o.
        sig = jax.nn.sigmoid(gates)
        tnh = jnp.tanh(gates)
        i_g = sig[:, 0 * H:1 * H]
        f_g = sig[:, 1 * H:2 * H]
        g_g = tnh[:, 2 * H:3 * H]
        o_g = sig[:, 3 * H:4 * H]
        c = f_g * c + i_g * g_g
        h = o_g * jnp.tanh(c)
        hs.append(h)

    hn_ref[0] = h.astype(hn_ref.dtype)
    cn_ref[0] = c.astype(cn_ref.dtype)

    # Batched MLP head over all T*Bp hidden states (vreg concat, no scratch);
    # single lane-dense y store.
    h_all = jnp.concatenate(hs, axis=0)                       # (T*Bp, H)
    z = jnp.maximum(
        jnp.dot(h_all, w1, preferred_element_type=jnp.float32) + b1, 0.0)
    y = jnp.dot(z, w2, preferred_element_type=jnp.float32) + b2
    y_ref[...] = y.astype(y_ref.dtype)


@jax.jit
def gaze_lstm_forward(x, h0, c0, wih_t, whh_t, b, w1_t, b1, w2_t, b2):
    T, B, D = x.shape
    H = whh_t.shape[0]
    H1 = w1_t.shape[1]

    # Pad batch to a multiple of 8 sublanes so all per-step tiles are dense.
    Bp = ((B + SUBLANE - 1) // SUBLANE) * SUBLANE
    pad = Bp - B
    if pad:
        x = jnp.pad(x, ((0, 0), (0, pad), (0, 0)))
        h0 = jnp.pad(h0, ((0, pad), (0, 0)))
        c0 = jnp.pad(c0, ((0, pad), (0, 0)))

    # Lane-pad the output head so the kernel's single y store is dense.
    # (Appropriate for small T*Bp; at serving scale pack outputs instead.)
    w2p = jnp.zeros((H1, OUT_PAD), jnp.float32).at[:, :OUTPUT_SIZE].set(w2_t)
    b2p = jnp.zeros((1, OUT_PAD), jnp.float32).at[:, :OUTPUT_SIZE].set(b2)

    x_flat = x.reshape(T * Bp, D)
    vmem = pl.BlockSpec(memory_space=pltpu.MemorySpace.VMEM)

    # Advisory cost estimate for XLA scheduling around the custom call.
    flops = (2 * T * Bp * D * 4 * H          # input projection
             + 2 * T * Bp * H * 4 * H        # recurrent matmuls
             + 2 * T * Bp * H * H1           # head layer 1
             + 2 * T * Bp * H1 * OUT_PAD)    # head layer 2 (padded)
    transcendentals = T * Bp * (4 * H + 4 * H + H)   # sigmoid + tanh + tanh(c)
    bytes_in = 4 * (T * Bp * D + 2 * Bp * H + D * 4 * H + H * 4 * H + 4 * H
                    + H * H1 + H1 + H1 * OUT_PAD + OUT_PAD)
    bytes_out = 4 * (T * Bp * OUT_PAD + 2 * Bp * H)
    cost = pl.CostEstimate(flops=flops, transcendentals=transcendentals,
                           bytes_accessed=bytes_in + bytes_out)

    y_pad, hn, cn = pl.pallas_call(
        gaze_lstm_kernel,
        out_shape=(
            jax.ShapeDtypeStruct((T * Bp, OUT_PAD), jnp.float32),  # y (padded)
            jax.ShapeDtypeStruct((1, Bp, H), jnp.float32),         # hn
            jax.ShapeDtypeStruct((1, Bp, H), jnp.float32),         # cn
        ),
        in_specs=[vmem] * 10,
        out_specs=(vmem, vmem, vmem),
        compiler_params=pltpu.CompilerParams(
            vmem_limit_bytes=32 * 1024 * 1024),
        cost_estimate=cost,
    )(x_flat, h0, c0, wih_t, whh_t, b, w1_t, b1, w2p, b2p)

    # TODO(synk): for v7x multi-sequence serving, shard independent sequence
    # chunks over a leading "parallel" grid axis to use both TensorCores, and
    # re-derive the VMEM budget (64 MiB physical) when T*Bp scales.
    y = y_pad.reshape(T, Bp, OUT_PAD)[:, :B, :OUTPUT_SIZE]
    hn = hn[:, :B, :]
    cn = cn[:, :B, :]
    return y, hn, cn


def lstm_mlp_reference(x, h0, c0, wih_t, whh_t, b, w1_t, b1, w2_t, b2):
    """Pure-JAX reference matching PyTorch nn.LSTM + per-timestep MLP."""
    H = whh_t.shape[0]

    def step(carry, x_t):
        h, c = carry
        gates = x_t @ wih_t + h @ whh_t + b[0]
        i_g = jax.nn.sigmoid(gates[:, 0 * H:1 * H])
        f_g = jax.nn.sigmoid(gates[:, 1 * H:2 * H])
        g_g = jnp.tanh(gates[:, 2 * H:3 * H])
        o_g = jax.nn.sigmoid(gates[:, 3 * H:4 * H])
        c_new = f_g * c + i_g * g_g
        h_new = o_g * jnp.tanh(c_new)
        z = jnp.maximum(h_new @ w1_t + b1[0], 0.0)
        y = z @ w2_t + b2[0]
        return (h_new, c_new), y

    (hn, cn), ys = jax.lax.scan(step, (h0, c0), x)
    return ys, hn[None], cn[None]


if __name__ == "__main__":
    # Model config: instance_size = |gaze_l| + |gaze_r| + |head| = 9,
    # hidden_sizes = [32, 16]  ->  LSTM(9, 32), Linear(32,16), ReLU, Linear(16,3).
    T, B, D, H, H1 = 8, 2, 9, 32, 16

    key = jax.random.PRNGKey(0)
    ks = jax.random.split(key, 10)
    s = 1.0 / jnp.sqrt(H)  # PyTorch-style uniform(-1/sqrt(H), 1/sqrt(H)) init

    wih_t = jax.random.uniform(ks[0], (D, 4 * H), jnp.float32, -s, s)   # W_ih^T
    whh_t = jax.random.uniform(ks[1], (H, 4 * H), jnp.float32, -s, s)   # W_hh^T
    b_ih = jax.random.uniform(ks[2], (4 * H,), jnp.float32, -s, s)
    b_hh = jax.random.uniform(ks[3], (4 * H,), jnp.float32, -s, s)
    b = (b_ih + b_hh)[None, :]                                          # (1, 4H)

    w1_t = jax.random.uniform(ks[4], (H, H1), jnp.float32, -s, s)
    b1 = jax.random.uniform(ks[5], (1, H1), jnp.float32, -s, s)
    w2_t = jax.random.uniform(ks[6], (H1, OUTPUT_SIZE), jnp.float32, -s, s)
    b2 = jax.random.uniform(ks[7], (1, OUTPUT_SIZE), jnp.float32, -s, s)

    x = jax.random.normal(ks[8], (T, B, D), jnp.float32)
    h0 = jnp.zeros((B, H), jnp.float32)
    c0 = jnp.zeros((B, H), jnp.float32)

    y, hn, cn = gaze_lstm_forward(x, h0, c0, wih_t, whh_t, b, w1_t, b1, w2_t, b2)
    jax.block_until_ready((y, hn, cn))

    y_ref, hn_ref, cn_ref = lstm_mlp_reference(
        x, h0, c0, wih_t, whh_t, b, w1_t, b1, w2_t, b2)

    assert y.shape == (T, B, OUTPUT_SIZE) and hn.shape == (1, B, H) and cn.shape == (1, B, H)
    assert jnp.allclose(y, y_ref, atol=1e-5, rtol=1e-5)
    assert jnp.allclose(hn, hn_ref, atol=1e-5, rtol=1e-5)
    assert jnp.allclose(cn, cn_ref, atol=1e-5, rtol=1e-5)

    print("KERNEL_OK")
</pallas_src>

<mosaic_0001>
module attributes {stable_mosaic.version = 11 : i64} {
  func.func @gaze_lstm_kernel(%arg0: memref<64x9xf32, #tpu.memory_space<vmem>>, %arg1: memref<8x32xf32, #tpu.memory_space<vmem>>, %arg2: memref<8x32xf32, #tpu.memory_space<vmem>>, %arg3: memref<9x128xf32, #tpu.memory_space<vmem>>, %arg4: memref<32x128xf32, #tpu.memory_space<vmem>>, %arg5: memref<1x128xf32, #tpu.memory_space<vmem>>, %arg6: memref<32x16xf32, #tpu.memory_space<vmem>>, %arg7: memref<1x16xf32, #tpu.memory_space<vmem>>, %arg8: memref<16x128xf32, #tpu.memory_space<vmem>>, %arg9: memref<1x128xf32, #tpu.memory_space<vmem>>, %arg10: memref<64x128xf32, #tpu.memory_space<vmem>>, %arg11: memref<1x8x32xf32, #tpu.memory_space<vmem>>, %arg12: memref<1x8x32xf32, #tpu.memory_space<vmem>>) attributes {dimension_semantics = [], scalar_prefetch = 0 : i64, scratch_operands = 0 : i64, tpu.core_type = #tpu.core_type<tc>} {
    %c0 = arith.constant 0 : index
    %c0_0 = arith.constant 0 : index
    %0 = vector.load %arg3[%c0, %c0_0] : memref<9x128xf32, #tpu.memory_space<vmem>>, vector<9x128xf32>
    %c0_1 = arith.constant 0 : index
    %c0_2 = arith.constant 0 : index
    %1 = vector.load %arg4[%c0_1, %c0_2] : memref<32x128xf32, #tpu.memory_space<vmem>>, vector<32x128xf32>
    %c0_3 = arith.constant 0 : index
    %c0_4 = arith.constant 0 : index
    %2 = vector.load %arg5[%c0_3, %c0_4] : memref<1x128xf32, #tpu.memory_space<vmem>>, vector<1x128xf32>
    %c0_5 = arith.constant 0 : index
    %c0_6 = arith.constant 0 : index
    %3 = vector.load %arg6[%c0_5, %c0_6] : memref<32x16xf32, #tpu.memory_space<vmem>>, vector<32x16xf32>
    %c0_7 = arith.constant 0 : index
    %c0_8 = arith.constant 0 : index
    %4 = vector.load %arg7[%c0_7, %c0_8] : memref<1x16xf32, #tpu.memory_space<vmem>>, vector<1x16xf32>
    %c0_9 = arith.constant 0 : index
    %c0_10 = arith.constant 0 : index
    %5 = vector.load %arg8[%c0_9, %c0_10] : memref<16x128xf32, #tpu.memory_space<vmem>>, vector<16x128xf32>
    %c0_11 = arith.constant 0 : index
    %c0_12 = arith.constant 0 : index
    %6 = vector.load %arg9[%c0_11, %c0_12] : memref<1x128xf32, #tpu.memory_space<vmem>>, vector<1x128xf32>
    %c0_13 = arith.constant 0 : index
    %c0_14 = arith.constant 0 : index
    %7 = vector.load %arg0[%c0_13, %c0_14] : memref<64x9xf32, #tpu.memory_space<vmem>>, vector<64x9xf32>
    %cst = arith.constant dense<0.000000e+00> : vector<64x128xf32>
    %8 = tpu.matmul %7, %0, %cst {dimension_numbers = #tpu.dot_dimension_numbers<[1], [0], [0], [1], [0, 0, 1, 1], [], []>} : vector<64x9xf32>, vector<9x128xf32>, vector<64x128xf32> -> vector<64x128xf32>
    %9 = vector.broadcast %2 : vector<1x128xf32> to vector<64x128xf32>
    %10 = arith.addf %8, %9 : vector<64x128xf32>
    %c0_15 = arith.constant 0 : index
    %c0_16 = arith.constant 0 : index
    %11 = vector.load %arg1[%c0_15, %c0_16] : memref<8x32xf32, #tpu.memory_space<vmem>>, vector<8x32xf32>
    %c0_17 = arith.constant 0 : index
    %c0_18 = arith.constant 0 : index
    %12 = vector.load %arg2[%c0_17, %c0_18] : memref<8x32xf32, #tpu.memory_space<vmem>>, vector<8x32xf32>
    %13 = vector.extract_strided_slice %10 {offsets = [0, 0], sizes = [8, 128], strides = [1, 1]} : vector<64x128xf32> to vector<8x128xf32>
    %cst_19 = arith.constant dense<0.000000e+00> : vector<8x128xf32>
    %14 = tpu.matmul %11, %1, %cst_19 {dimension_numbers = #tpu.dot_dimension_numbers<[1], [0], [0], [1], [0, 0, 1, 1], [], []>} : vector<8x32xf32>, vector<32x128xf32>, vector<8x128xf32> -> vector<8x128xf32>
    %15 = arith.addf %13, %14 : vector<8x128xf32>
    %16 = arith.negf %15 : vector<8x128xf32>
    %17 = math.exp %16 : vector<8x128xf32>
    %cst_20 = arith.constant 1.000000e+00 : f32
    %18 = vector.broadcast %cst_20 : f32 to vector<8x128xf32>
    %19 = arith.addf %18, %17 : vector<8x128xf32>
    %20 = arith.divf %18, %19 : vector<8x128xf32>
    %21 = math.tanh %15 : vector<8x128xf32>
    %22 = vector.extract_strided_slice %20 {offsets = [0, 0], sizes = [8, 32], strides = [1, 1]} : vector<8x128xf32> to vector<8x32xf32>
    %23 = vector.extract_strided_slice %20 {offsets = [0, 32], sizes = [8, 32], strides = [1, 1]} : vector<8x128xf32> to vector<8x32xf32>
    %24 = vector.extract_strided_slice %21 {offsets = [0, 64], sizes = [8, 32], strides = [1, 1]} : vector<8x128xf32> to vector<8x32xf32>
    %25 = vector.extract_strided_slice %20 {offsets = [0, 96], sizes = [8, 32], strides = [1, 1]} : vector<8x128xf32> to vector<8x32xf32>
    %26 = arith.mulf %23, %12 : vector<8x32xf32>
    %27 = arith.mulf %22, %24 : vector<8x32xf32>
    %28 = arith.addf %26, %27 : vector<8x32xf32>
    %29 = math.tanh %28 : vector<8x32xf32>
    %30 = arith.mulf %25, %29 : vector<8x32xf32>
    %31 = vector.extract_strided_slice %10 {offsets = [8, 0], sizes = [8, 128], strides = [1, 1]} : vector<64x128xf32> to vector<8x128xf32>
    %cst_21 = arith.constant dense<0.000000e+00> : vector<8x128xf32>
    %32 = tpu.matmul %30, %1, %cst_21 {dimension_numbers = #tpu.dot_dimension_numbers<[1], [0], [0], [1], [0, 0, 1, 1], [], []>} : vector<8x32xf32>, vector<32x128xf32>, vector<8x128xf32> -> vector<8x128xf32>
    %33 = arith.addf %31, %32 : vector<8x128xf32>
    %34 = arith.negf %33 : vector<8x128xf32>
    %35 = math.exp %34 : vector<8x128xf32>
    %cst_22 = arith.constant 1.000000e+00 : f32
    %36 = vector.broadcast %cst_22 : f32 to vector<8x128xf32>
    %37 = arith.addf %36, %35 : vector<8x128xf32>
    %38 = arith.divf %36, %37 : vector<8x128xf32>
    %39 = math.tanh %33 : vector<8x128xf32>
    %40 = vector.extract_strided_slice %38 {offsets = [0, 0], sizes = [8, 32], strides = [1, 1]} : vector<8x128xf32> to vector<8x32xf32>
    %41 = vector.extract_strided_slice %38 {offsets = [0, 32], sizes = [8, 32], strides = [1, 1]} : vector<8x128xf32> to vector<8x32xf32>
    %42 = vector.extract_strided_slice %39 {offsets = [0, 64], sizes = [8, 32], strides = [1, 1]} : vector<8x128xf32> to vector<8x32xf32>
    %43 = vector.extract_strided_slice %38 {offsets = [0, 96], sizes = [8, 32], strides = [1, 1]} : vector<8x128xf32> to vector<8x32xf32>
    %44 = arith.mulf %41, %28 : vector<8x32xf32>
    %45 = arith.mulf %40, %42 : vector<8x32xf32>
    %46 = arith.addf %44, %45 : vector<8x32xf32>
    %47 = math.tanh %46 : vector<8x32xf32>
    %48 = arith.mulf %43, %47 : vector<8x32xf32>
    %49 = vector.extract_strided_slice %10 {offsets = [16, 0], sizes = [8, 128], strides = [1, 1]} : vector<64x128xf32> to vector<8x128xf32>
    %cst_23 = arith.constant dense<0.000000e+00> : vector<8x128xf32>
    %50 = tpu.matmul %48, %1, %cst_23 {dimension_numbers = #tpu.dot_dimension_numbers<[1], [0], [0], [1], [0, 0, 1, 1], [], []>} : vector<8x32xf32>, vector<32x128xf32>, vector<8x128xf32> -> vector<8x128xf32>
    %51 = arith.addf %49, %50 : vector<8x128xf32>
    %52 = arith.negf %51 : vector<8x128xf32>
    %53 = math.exp %52 : vector<8x128xf32>
    %cst_24 = arith.constant 1.000000e+00 : f32
    %54 = vector.broadcast %cst_24 : f32 to vector<8x128xf32>
    %55 = arith.addf %54, %53 : vector<8x128xf32>
    %56 = arith.divf %54, %55 : vector<8x128xf32>
    %57 = math.tanh %51 : vector<8x128xf32>
    %58 = vector.extract_strided_slice %56 {offsets = [0, 0], sizes = [8, 32], strides = [1, 1]} : vector<8x128xf32> to vector<8x32xf32>
    %59 = vector.extract_strided_slice %56 {offsets = [0, 32], sizes = [8, 32], strides = [1, 1]} : vector<8x128xf32> to vector<8x32xf32>
    %60 = vector.extract_strided_slice %57 {offsets = [0, 64], sizes = [8, 32], strides = [1, 1]} : vector<8x128xf32> to vector<8x32xf32>
    %61 = vector.extract_strided_slice %56 {offsets = [0, 96], sizes = [8, 32], strides = [1, 1]} : vector<8x128xf32> to vector<8x32xf32>
    %62 = arith.mulf %59, %46 : vector<8x32xf32>
    %63 = arith.mulf %58, %60 : vector<8x32xf32>
    %64 = arith.addf %62, %63 : vector<8x32xf32>
    %65 = math.tanh %64 : vector<8x32xf32>
    %66 = arith.mulf %61, %65 : vector<8x32xf32>
    %67 = vector.extract_strided_slice %10 {offsets = [24, 0], sizes = [8, 128], strides = [1, 1]} : vector<64x128xf32> to vector<8x128xf32>
    %cst_25 = arith.constant dense<0.000000e+00> : vector<8x128xf32>
    %68 = tpu.matmul %66, %1, %cst_25 {dimension_numbers = #tpu.dot_dimension_numbers<[1], [0], [0], [1], [0, 0, 1, 1], [], []>} : vector<8x32xf32>, vector<32x128xf32>, vector<8x128xf32> -> vector<8x128xf32>
    %69 = arith.addf %67, %68 : vector<8x128xf32>
    %70 = arith.negf %69 : vector<8x128xf32>
    %71 = math.exp %70 : vector<8x128xf32>
    %cst_26 = arith.constant 1.000000e+00 : f32
    %72 = vector.broadcast %cst_26 : f32 to vector<8x128xf32>
    %73 = arith.addf %72, %71 : vector<8x128xf32>
    %74 = arith.divf %72, %73 : vector<8x128xf32>
    %75 = math.tanh %69 : vector<8x128xf32>
    %76 = vector.extract_strided_slice %74 {offsets = [0, 0], sizes = [8, 32], strides = [1, 1]} : vector<8x128xf32> to vector<8x32xf32>
    %77 = vector.extract_strided_slice %74 {offsets = [0, 32], sizes = [8, 32], strides = [1, 1]} : vector<8x128xf32> to vector<8x32xf32>
    %78 = vector.extract_strided_slice %75 {offsets = [0, 64], sizes = [8, 32], strides = [1, 1]} : vector<8x128xf32> to vector<8x32xf32>
    %79 = vector.extract_strided_slice %74 {offsets = [0, 96], sizes = [8, 32], strides = [1, 1]} : vector<8x128xf32> to vector<8x32xf32>
    %80 = arith.mulf %77, %64 : vector<8x32xf32>
    %81 = arith.mulf %76, %78 : vector<8x32xf32>
    %82 = arith.addf %80, %81 : vector<8x32xf32>
    %83 = math.tanh %82 : vector<8x32xf32>
    %84 = arith.mulf %79, %83 : vector<8x32xf32>
    %85 = vector.extract_strided_slice %10 {offsets = [32, 0], sizes = [8, 128], strides = [1, 1]} : vector<64x128xf32> to vector<8x128xf32>
    %cst_27 = arith.constant dense<0.000000e+00> : vector<8x128xf32>
    %86 = tpu.matmul %84, %1, %cst_27 {dimension_numbers = #tpu.dot_dimension_numbers<[1], [0], [0], [1], [0, 0, 1, 1], [], []>} : vector<8x32xf32>, vector<32x128xf32>, vector<8x128xf32> -> vector<8x128xf32>
    %87 = arith.addf %85, %86 : vector<8x128xf32>
    %88 = arith.negf %87 : vector<8x128xf32>
    %89 = math.exp %88 : vector<8x128xf32>
    %cst_28 = arith.constant 1.000000e+00 : f32
    %90 = vector.broadcast %cst_28 : f32 to vector<8x128xf32>
    %91 = arith.addf %90, %89 : vector<8x128xf32>
    %92 = arith.divf %90, %91 : vector<8x128xf32>
    %93 = math.tanh %87 : vector<8x128xf32>
    %94 = vector.extract_strided_slice %92 {offsets = [0, 0], sizes = [8, 32], strides = [1, 1]} : vector<8x128xf32> to vector<8x32xf32>
    %95 = vector.extract_strided_slice %92 {offsets = [0, 32], sizes = [8, 32], strides = [1, 1]} : vector<8x128xf32> to vector<8x32xf32>
    %96 = vector.extract_strided_slice %93 {offsets = [0, 64], sizes = [8, 32], strides = [1, 1]} : vector<8x128xf32> to vector<8x32xf32>
    %97 = vector.extract_strided_slice %92 {offsets = [0, 96], sizes = [8, 32], strides = [1, 1]} : vector<8x128xf32> to vector<8x32xf32>
    %98 = arith.mulf %95, %82 : vector<8x32xf32>
    %99 = arith.mulf %94, %96 : vector<8x32xf32>
    %100 = arith.addf %98, %99 : vector<8x32xf32>
    %101 = math.tanh %100 : vector<8x32xf32>
    %102 = arith.mulf %97, %101 : vector<8x32xf32>
    %103 = vector.extract_strided_slice %10 {offsets = [40, 0], sizes = [8, 128], strides = [1, 1]} : vector<64x128xf32> to vector<8x128xf32>
    %cst_29 = arith.constant dense<0.000000e+00> : vector<8x128xf32>
    %104 = tpu.matmul %102, %1, %cst_29 {dimension_numbers = #tpu.dot_dimension_numbers<[1], [0], [0], [1], [0, 0, 1, 1], [], []>} : vector<8x32xf32>, vector<32x128xf32>, vector<8x128xf32> -> vector<8x128xf32>
    %105 = arith.addf %103, %104 : vector<8x128xf32>
    %106 = arith.negf %105 : vector<8x128xf32>
    %107 = math.exp %106 : vector<8x128xf32>
    %cst_30 = arith.constant 1.000000e+00 : f32
    %108 = vector.broadcast %cst_30 : f32 to vector<8x128xf32>
    %109 = arith.addf %108, %107 : vector<8x128xf32>
    %110 = arith.divf %108, %109 : vector<8x128xf32>
    %111 = math.tanh %105 : vector<8x128xf32>
    %112 = vector.extract_strided_slice %110 {offsets = [0, 0], sizes = [8, 32], strides = [1, 1]} : vector<8x128xf32> to vector<8x32xf32>
    %113 = vector.extract_strided_slice %110 {offsets = [0, 32], sizes = [8, 32], strides = [1, 1]} : vector<8x128xf32> to vector<8x32xf32>
    %114 = vector.extract_strided_slice %111 {offsets = [0, 64], sizes = [8, 32], strides = [1, 1]} : vector<8x128xf32> to vector<8x32xf32>
    %115 = vector.extract_strided_slice %110 {offsets = [0, 96], sizes = [8, 32], strides = [1, 1]} : vector<8x128xf32> to vector<8x32xf32>
    %116 = arith.mulf %113, %100 : vector<8x32xf32>
    %117 = arith.mulf %112, %114 : vector<8x32xf32>
    %118 = arith.addf %116, %117 : vector<8x32xf32>
    %119 = math.tanh %118 : vector<8x32xf32>
    %120 = arith.mulf %115, %119 : vector<8x32xf32>
    %121 = vector.extract_strided_slice %10 {offsets = [48, 0], sizes = [8, 128], strides = [1, 1]} : vector<64x128xf32> to vector<8x128xf32>
    %cst_31 = arith.constant dense<0.000000e+00> : vector<8x128xf32>
    %122 = tpu.matmul %120, %1, %cst_31 {dimension_numbers = #tpu.dot_dimension_numbers<[1], [0], [0], [1], [0, 0, 1, 1], [], []>} : vector<8x32xf32>, vector<32x128xf32>, vector<8x128xf32> -> vector<8x128xf32>
    %123 = arith.addf %121, %122 : vector<8x128xf32>
    %124 = arith.negf %123 : vector<8x128xf32>
    %125 = math.exp %124 : vector<8x128xf32>
    %cst_32 = arith.constant 1.000000e+00 : f32
    %126 = vector.broadcast %cst_32 : f32 to vector<8x128xf32>
    %127 = arith.addf %126, %125 : vector<8x128xf32>
    %128 = arith.divf %126, %127 : vector<8x128xf32>
    %129 = math.tanh %123 : vector<8x128xf32>
    %130 = vector.extract_strided_slice %128 {offsets = [0, 0], sizes = [8, 32], strides = [1, 1]} : vector<8x128xf32> to vector<8x32xf32>
    %131 = vector.extract_strided_slice %128 {offsets = [0, 32], sizes = [8, 32], strides = [1, 1]} : vector<8x128xf32> to vector<8x32xf32>
    %132 = vector.extract_strided_slice %129 {offsets = [0, 64], sizes = [8, 32], strides = [1, 1]} : vector<8x128xf32> to vector<8x32xf32>
    %133 = vector.extract_strided_slice %128 {offsets = [0, 96], sizes = [8, 32], strides = [1, 1]} : vector<8x128xf32> to vector<8x32xf32>
    %134 = arith.mulf %131, %118 : vector<8x32xf32>
    %135 = arith.mulf %130, %132 : vector<8x32xf32>
    %136 = arith.addf %134, %135 : vector<8x32xf32>
    %137 = math.tanh %136 : vector<8x32xf32>
    %138 = arith.mulf %133, %137 : vector<8x32xf32>
    %139 = vector.extract_strided_slice %10 {offsets = [56, 0], sizes = [8, 128], strides = [1, 1]} : vector<64x128xf32> to vector<8x128xf32>
    %cst_33 = arith.constant dense<0.000000e+00> : vector<8x128xf32>
    %140 = tpu.matmul %138, %1, %cst_33 {dimension_numbers = #tpu.dot_dimension_numbers<[1], [0], [0], [1], [0, 0, 1, 1], [], []>} : vector<8x32xf32>, vector<32x128xf32>, vector<8x128xf32> -> vector<8x128xf32>
    %141 = arith.addf %139, %140 : vector<8x128xf32>
    %142 = arith.negf %141 : vector<8x128xf32>
    %143 = math.exp %142 : vector<8x128xf32>
    %cst_34 = arith.constant 1.000000e+00 : f32
    %144 = vector.broadcast %cst_34 : f32 to vector<8x128xf32>
    %145 = arith.addf %144, %143 : vector<8x128xf32>
    %146 = arith.divf %144, %145 : vector<8x128xf32>
    %147 = math.tanh %141 : vector<8x128xf32>
    %148 = vector.extract_strided_slice %146 {offsets = [0, 0], sizes = [8, 32], strides = [1, 1]} : vector<8x128xf32> to vector<8x32xf32>
    %149 = vector.extract_strided_slice %146 {offsets = [0, 32], sizes = [8, 32], strides = [1, 1]} : vector<8x128xf32> to vector<8x32xf32>
    %150 = vector.extract_strided_slice %147 {offsets = [0, 64], sizes = [8, 32], strides = [1, 1]} : vector<8x128xf32> to vector<8x32xf32>
    %151 = vector.extract_strided_slice %146 {offsets = [0, 96], sizes = [8, 32], strides = [1, 1]} : vector<8x128xf32> to vector<8x32xf32>
    %152 = arith.mulf %149, %136 : vector<8x32xf32>
    %153 = arith.mulf %148, %150 : vector<8x32xf32>
    %154 = arith.addf %152, %153 : vector<8x32xf32>
    %155 = math.tanh %154 : vector<8x32xf32>
    %156 = arith.mulf %151, %155 : vector<8x32xf32>
    %c0_35 = arith.constant 0 : index
    %c0_36 = arith.constant 0 : index
    %c0_37 = arith.constant 0 : index
    %157 = vector.load %arg11[%c0_35, %c0_36, %c0_37] : memref<1x8x32xf32, #tpu.memory_space<vmem>>, vector<1x8x32xf32>
    %158 = vector.shape_cast %157 : vector<1x8x32xf32> to vector<8x32xf32>
    %159 = vector.shape_cast %156 : vector<8x32xf32> to vector<1x8x32xf32>
    tpu.vector_store %arg11[%c0_35, %c0_36, %c0_37], %159 {strides = array<i32>} : memref<1x8x32xf32, #tpu.memory_space<vmem>>, vector<1x8x32xf32>,
    %c0_38 = arith.constant 0 : index
    %c0_39 = arith.constant 0 : index
    %c0_40 = arith.constant 0 : index
    %160 = vector.load %arg12[%c0_38, %c0_39, %c0_40] : memref<1x8x32xf32, #tpu.memory_space<vmem>>, vector<1x8x32xf32>
    %161 = vector.shape_cast %160 : vector<1x8x32xf32> to vector<8x32xf32>
    %162 = vector.shape_cast %154 : vector<8x32xf32> to vector<1x8x32xf32>
    tpu.vector_store %arg12[%c0_38, %c0_39, %c0_40], %162 {strides = array<i32>} : memref<1x8x32xf32, #tpu.memory_space<vmem>>, vector<1x8x32xf32>,
    %163 = tpu.concatenate %30, %48, %66, %84, %102, %120, %138, %156 in 0 : vector<8x32xf32>, vector<8x32xf32>, vector<8x32xf32>, vector<8x32xf32>, vector<8x32xf32>, vector<8x32xf32>, vector<8x32xf32>, vector<8x32xf32> -> vector<64x32xf32>
    %cst_41 = arith.constant dense<0.000000e+00> : vector<64x16xf32>
    %164 = tpu.matmul %163, %3, %cst_41 {dimension_numbers = #tpu.dot_dimension_numbers<[1], [0], [0], [1], [0, 0, 1, 1], [], []>} : vector<64x32xf32>, vector<32x16xf32>, vector<64x16xf32> -> vector<64x16xf32>
    %165 = vector.broadcast %4 : vector<1x16xf32> to vector<64x16xf32>
    %166 = arith.addf %164, %165 : vector<64x16xf32>
    %cst_42 = arith.constant 0.000000e+00 : f32
    %167 = vector.broadcast %cst_42 : f32 to vector<64x16xf32>
    %168 = arith.maximumf %166, %167 : vector<64x16xf32>
    %cst_43 = arith.constant dense<0.000000e+00> : vector<64x128xf32>
    %169 = tpu.matmul %168, %5, %cst_43 {dimension_numbers = #tpu.dot_dimension_numbers<[1], [0], [0], [1], [0, 0, 1, 1], [], []>} : vector<64x16xf32>, vector<16x128xf32>, vector<64x128xf32> -> vector<64x128xf32>
    %170 = vector.broadcast %6 : vector<1x128xf32> to vector<64x128xf32>
    %171 = arith.addf %169, %170 : vector<64x128xf32>
    %c0_44 = arith.constant 0 : index
    %c0_45 = arith.constant 0 : index
    %172 = vector.load %arg10[%c0_44, %c0_45] : memref<64x128xf32, #tpu.memory_space<vmem>>, vector<64x128xf32>
    tpu.vector_store %arg10[%c0_44, %c0_45], %171 {strides = array<i32>} : memref<64x128xf32, #tpu.memory_space<vmem>>, vector<64x128xf32>,
    return
  }
}

</mosaic_0001>

<bundles_post_ra>
// kernel: gaze_lstm_forward.1
= control target key start
LH: loop header
LB: loop body
LE: loop exit
PB: predicated region body
PF: predicated region fallthrough
CT: control target
= control target key end

     0   :  { %vm89_vm0 = vcmask 1040384   ;;  %vm64_vm1 = vcmask 72704   ;;  %vm136_vm2 = vcmask 261120   ;;  %s913_s18 = smov 64   ;;  %s914_s21 = smov 32   ;;  %s1239_s4 = inlined_call_operand.vmem [shape: f32[32,128], index: 4, kind: input, shape index: {}]   ;;  %s1240_s3 = inlined_call_operand.vmem [shape: f32[9,128], index: 3, kind: input, shape index: {}]   ;;  %s1241_s0 = inlined_call_operand.vmem [shape: f32[64,9], index: 0, kind: input, shape index: {}]   ;;  %s1242_s5 = inlined_call_operand.vmem [shape: f32[1,128], index: 5, kind: input, shape index: {}]   ;;  %s1243_s1 = inlined_call_operand.vmem [shape: f32[8,32], index: 1, kind: input, shape index: {}]   ;;  %s1244_s2 = inlined_call_operand.vmem [shape: f32[8,32], index: 2, kind: input, shape index: {}]   ;;  %s1245_s6 = inlined_call_operand.vmem [shape: f32[32,16], index: 6, kind: input, shape index: {}]   ;;  %s1246_s7 = inlined_call_operand.vmem [shape: f32[1,16], index: 7, kind: input, shape index: {}]   ;;  %s1247_s8 = inlined_call_operand.vmem [shape: f32[16,128], index: 8, kind: input, shape index: {}]   ;;  %s1248_s9 = inlined_call_operand.vmem [shape: f32[1,128], index: 9, kind: input, shape index: {}]   ;;  %s1249_s10 = inlined_call_operand.vmem [shape: f32[64,128], index: 10, kind: output, shape index: {0}]   ;;  %s1250_s12 = inlined_call_operand.vmem [shape: f32[1,8,32], index: 12, kind: output, shape index: {2}]   ;;  %s1251_s11 = inlined_call_operand.vmem [shape: f32[1,8,32], index: 11, kind: output, shape index: {1}]  }
   0x1   :  { %v984_v0 = vld [vmem:[%s1239_s4 + $0x18] sm:$0xff]  ;;  %v39_v1 = vld [vmem:[%s1240_s3 + $0x8] sm:$0x1]  ;;  %v992_v2 = vld [vmem:[%s1239_s4 + $0x10] sm:$0xff] }
   0x2   :  { %152 = vmatpush.msra.mxu1 %v984_v0  ;;  %796 = vmatpush.msk.msra.mxu0 %vm89_vm0, %v39_v1  ;;  %v38_v3 = vld [vmem:[%s1240_s3] sm:$0xff]  ;;  %v1004_v5 = vld [vmem:[%s1239_s4 + $0x8] sm:$0xff]  ;;  %v55_v1 = vld [vmem:[%s1241_s0 + $0x10] sm:$0xff] }
   0x3   :  { %v53_v4 = vld [vmem:[%s1241_s0] sm:$0xff]  ;;  %219 = vmatpush.msra.mxu2 %v984_v0  ;;  %282 = vmatpush.msra.mxu3 %v984_v0  ;;  %v54_v37 = vld [vmem:[%s1241_s0 + $0x8] sm:$0xff] }
   0x4   :  { %153 = vmatpush.msra.mxu1 %v992_v2  ;;  %108 = vmatpush.msra.mxu0 %v38_v3  ;;  %v1013_v6 = vld [vmem:[%s1239_s4] sm:$0xff] }
   0x5   :  { %797 = vmatmul.msk.f32.vlgmr.msra.gmra.mxu0 %vm64_vm1, %v53_v4  ;;  %220 = vmatpush.msra.mxu2 %v992_v2  ;;  %v134_v7 = vld [vmem:[%s1243_s1] sm:$0xff] }
   0x6   :  { %154 = vmatpush.msra.mxu1 %v1004_v5  ;;  %283 = vmatpush.msra.mxu3 %v992_v2  ;;  %v1046_v8 = vld [vmem:[%s1242_s5] ss:$0 sm:$0xff] }
   0x7   :  { %221 = vmatpush.msra.mxu2 %v1004_v5  ;;  %v135_v14 = vld [vmem:[%s1244_s2] sm:$0xff] }
   0x8   :  { %155 = vmatpush.msra.mxu1 %v1013_v6  ;;  %284 = vmatpush.msra.mxu3 %v1004_v5 }
   0x9   :  { %805 = vmatmul.msk.f32.vlgmr.msra.gmra.mxu1 %vm136_vm2, %v134_v7  ;;  %222 = vmatpush.msra.mxu2 %v1013_v6 }
   0xa   :  { %285 = vmatpush.msra.mxu3 %v1013_v6  ;;  %345 = vmatpush.msrb.mxu1 %v984_v0 }
   0xb   :  { %408 = vmatpush.msrb.mxu2 %v984_v0 }
   0xc   :  { %471 = vmatpush.msrb.mxu3 %v984_v0  ;;  %346 = vmatpush.msrb.mxu1 %v992_v2 }
   0xd   :  { %409 = vmatpush.msrb.mxu2 %v992_v2  ;;  %798 = vmatmul.msk.f32.gmra.mxu0 %vm64_vm1, %v54_v37 }
   0xe   :  { %472 = vmatpush.msrb.mxu3 %v992_v2  ;;  %347 = vmatpush.msrb.mxu1 %v1004_v5 }
   0xf   :  { %410 = vmatpush.msrb.mxu2 %v1004_v5 }
  0x10   :  { %473 = vmatpush.msrb.mxu3 %v1004_v5  ;;  %348 = vmatpush.msrb.mxu1 %v1013_v6 }
  0x11   :  { %411 = vmatpush.msrb.mxu2 %v1013_v6 }
  0x12   :  { %474 = vmatpush.msrb.mxu3 %v1013_v6  ;;  %534 = vmatpush.msra.mxu1 %v984_v0 }
  0x14   :  { %535 = vmatpush.msra.mxu1 %v992_v2 }
  0x15   :  { %799 = vmatmul.msk.f32.gmra.mxu0 %vm64_vm1, %v55_v1 }
  0x16   :  { %536 = vmatpush.msra.mxu1 %v1004_v5 }
  0x18   :  { %537 = vmatpush.msra.mxu1 %v1013_v6 }
  0x82   :  { %v110_v9 = vpop.f32.mrf.mxu0 }
  0x83   :  { %v111_v10 = vadd.f32 %v1046_v8, %v110_v9 }
  0x86   :  { %v157_v11 = vpop.f32.mrf.mxu1 }
  0x87   :  { %v160_v12 = vadd.f32 %v157_v11, %v111_v10 }
  0x89   :  { %849 = vtanh.f32 %v160_v12  ;;  %v806_v15 = vmul.f32 -1.442695, %v160_v12 }
  0x8a   :  { %v113_v39 = vpop.f32.mrf.mxu0 }
  0x8b   :  { %851 = vpow2.f32 %v806_v15  ;;  %v114_v40 = vadd.f32 %v1046_v8, %v113_v39 }
  0x8f   :  { %v850_v13 = vpop.eup %849 }
  0x90   :  { %187 = vrot.lane.b32.xlu0 %v850_v13, %s913_s18 }
  0x91   :  { %v852_v16 = vpop.eup %851 }
  0x92   :  { %v164_v17 = vadd.f32 1.0, %v852_v16  ;;  %v116_v3 = vpop.f32.mrf.mxu0 }
  0x93   :  { %v117_v4 = vadd.f32 %v1046_v8, %v116_v3 }
  0x94   :  { %853 = vrcp.f32 %v164_v17  ;;  %v176_v23 = vand.u32 2147483648, %v164_v17  ;;  %vm170_vm4 = vweird.f32 %v164_v17  ;;  %v174_v24 = vand.u32 2147483647, %v164_v17 }
  0x96   :  { %v177_v26 = vor.u32 1.1754944e-38, %v176_v23  ;;  %vm175_vm6 = vcmp.eq.f32.partialorder %v174_v24, 8.507059e+37 }
  0x98   :  { %182 = vrot.lane.b32.xlu0 %v135_v14, %s914_s21 }
  0x9a   :  { %v854_v18 = vpop.eup %853 }
  0x9b   :  { %v166_v19 = vmul.f32 %v854_v18, %v164_v17  ;;  %vm171_vm3 = vweird.f32 %v854_v18 }
  0x9c   :  { %vm172_vm5 = vmor %vm170_vm4, %vm171_vm3 }
  0x9d   :  { %v167_v20 = vsub.f32 1.0, %v166_v19 }
  0x9f   :  { %v168_v21 = vmul.f32 %v854_v18, %v167_v20 }
  0xa1   :  { %v169_v22 = vadd.f32 %v854_v18, %v168_v21 }
  0xa3   :  { %v173_v25 = vsel %vm172_vm5, %v854_v18, %v169_v22 }
  0xa4   :  { %v178_v28 = vsel %vm175_vm6, %v177_v26, %v173_v25 }
 0x102   :  { %v188_v27 = vpop.permute.xlu0 %187 }
 0x103   :  { %v190_v29 = vmul.f32 %v188_v27, %v178_v28 }
 0x105   :  { %192 = vrot.lane.b32.xlu1 %v190_v29, %s914_s21 }
 0x10a   :  { %v183_v30 = vpop.permute.xlu0 %182 }
 0x10b   :  { %v185_v31 = vmul.f32 %v183_v30, %v178_v28 }
 0x177   :  { %v193_v32 = vpop.permute.xlu1 %192 }
 0x178   :  { %v195_v33 = vadd.f32 %v193_v32, %v185_v31 }
 0x17a   :  { %855 = vtanh.f32 %v195_v33 }
 0x180   :  { %v856_v34 = vpop.eup %855 }
 0x181   :  { %198 = vrot.lane.b32.xlu1 %v856_v34, %s913_s18 }
 0x1f3   :  { %v199_v35 = vpop.permute.xlu1 %198 }
 0x1f4   :  { %v201_v36 = vmul.f32 %v199_v35, %v178_v28  ;;  %v56_v28 = vld [vmem:[%s1241_s0 + $0x18] sm:$0xff] }
 0x1f5   :  { %800 = vmatmul.msk.f32.gmra.mxu0 %vm64_vm1, %v56_v28  ;;  %v46_v28 = vld [vmem:[%s1245_s6 + $0x8] sm:$0xff] }
 0x1f6   :  { %203 = vrot.lane.b32.xlu2 %v201_v36, %s914_s21 }
 0x250   :  { %v1061_v38 = vpop.permute.xlu2 %203 }
 0x251   :  { %807 = vmatmul.msk.f32.vlgmr.msra.gmra.mxu2 %vm136_vm2, %v1061_v38 }
 0x252   :  { %597 = vmatpush.msra.mxu2 %v984_v0 }
 0x254   :  { %598 = vmatpush.msra.mxu2 %v992_v2 }
 0x256   :  { %599 = vmatpush.msra.mxu2 %v1004_v5 }
 0x258   :  { %600 = vmatpush.msra.mxu2 %v1013_v6 }
 0x272   :  { %v119_v32 = vpop.f32.mrf.mxu0 }
 0x2d4   :  { %v224_v41 = vpop.f32.mrf.mxu2 }
 0x2d5   :  { %v227_v42 = vadd.f32 %v224_v41, %v114_v40 }
 0x2d7   :  { %857 = vtanh.f32 %v227_v42  ;;  %v808_v44 = vmul.f32 -1.442695, %v227_v42 }
 0x2d9   :  { %859 = vpow2.f32 %v808_v44 }
 0x2dd   :  { %v858_v43 = vpop.eup %857 }
 0x2de   :  { %250 = vrot.lane.b32.xlu2 %v858_v43, %s913_s18 }
 0x2df   :  { %v860_v45 = vpop.eup %859 }
 0x2e0   :  { %v231_v46 = vadd.f32 1.0, %v860_v45 }
 0x2e2   :  { %861 = vrcp.f32 %v231_v46  ;;  %v243_v52 = vand.u32 2147483648, %v231_v46  ;;  %vm237_vm8 = vweird.f32 %v231_v46  ;;  %v241_v53 = vand.u32 2147483647, %v231_v46 }
 0x2e4   :  { %v244_v55 = vor.u32 1.1754944e-38, %v243_v52  ;;  %vm242_vm10 = vcmp.eq.f32.partialorder %v241_v53, 8.507059e+37 }
 0x2e8   :  { %v862_v47 = vpop.eup %861 }
 0x2e9   :  { %v233_v48 = vmul.f32 %v862_v47, %v231_v46  ;;  %vm238_vm7 = vweird.f32 %v862_v47 }
 0x2ea   :  { %vm239_vm9 = vmor %vm237_vm8, %vm238_vm7 }
 0x2eb   :  { %v234_v49 = vsub.f32 1.0, %v233_v48 }
 0x2ed   :  { %v235_v50 = vmul.f32 %v862_v47, %v234_v49 }
 0x2ef   :  { %v236_v51 = vadd.f32 %v862_v47, %v235_v50 }
 0x2f1   :  { %v240_v54 = vsel %vm239_vm9, %v862_v47, %v236_v51 }
 0x2f2   :  { %v245_v57 = vsel %vm242_vm10, %v244_v55, %v240_v54 }
 0x2f3   :  { %v248_v59 = vmul.f32 %v245_v57, %v195_v33  ;;  %v120_v33 = vadd.f32 %v1046_v8, %v119_v32 }
 0x338   :  { %v251_v56 = vpop.permute.xlu2 %250 }
 0x339   :  { %v253_v58 = vmul.f32 %v251_v56, %v245_v57 }
 0x33b   :  { %255 = vrot.lane.b32.xlu0 %v253_v58, %s914_s21 }
 0x3ad   :  { %v256_v60 = vpop.permute.xlu0 %255 }
 0x3ae   :  { %v258_v61 = vadd.f32 %v256_v60, %v248_v59  ;;  %v57_v59 = vld [vmem:[%s1241_s0 + $0x20] sm:$0xff] }
 0x3af   :  { %801 = vmatmul.msk.f32.gmra.mxu0 %vm64_vm1, %v57_v59 }
 0x3b0   :  { %863 = vtanh.f32 %v258_v61 }
 0x3b6   :  { %v864_v62 = vpop.eup %863 }
 0x3b7   :  { %261 = vrot.lane.b32.xlu1 %v864_v62, %s913_s18 }
 0x429   :  { %v262_v63 = vpop.permute.xlu1 %261 }
 0x42a   :  { %v264_v0 = vmul.f32 %v262_v63, %v245_v57 }
 0x42c   :  { %266 = vrot.lane.b32.xlu2 %v264_v0, %s914_s21 }
 0x486   :  { %v1078_v2 = vpop.permute.xlu2 %266 }
 0x487   :  { %809 = vmatmul.msk.f32.vlgmr.msra.gmra.mxu3 %vm136_vm2, %v1078_v2 }
 0x50a   :  { %v287_v5 = vpop.f32.mrf.mxu3 }
 0x50b   :  { %v290_v6 = vadd.f32 %v287_v5, %v117_v4 }
 0x50d   :  { %865 = vtanh.f32 %v290_v6  ;;  %v810_v9 = vmul.f32 -1.442695, %v290_v6 }
 0x50f   :  { %867 = vpow2.f32 %v810_v9 }
 0x513   :  { %v866_v7 = vpop.eup %865 }
 0x514   :  { %313 = vrot.lane.b32.xlu0 %v866_v7, %s913_s18 }
 0x515   :  { %v868_v10 = vpop.eup %867 }
 0x516   :  { %v294_v11 = vadd.f32 1.0, %v868_v10 }
 0x518   :  { %869 = vrcp.f32 %v294_v11  ;;  %v306_v17 = vand.u32 2147483648, %v294_v11  ;;  %vm300_vm12 = vweird.f32 %v294_v11  ;;  %v304_v18 = vand.u32 2147483647, %v294_v11 }
 0x51a   :  { %v307_v20 = vor.u32 1.1754944e-38, %v306_v17  ;;  %vm305_vm14 = vcmp.eq.f32.partialorder %v304_v18, 8.507059e+37 }
 0x51e   :  { %v870_v12 = vpop.eup %869 }
 0x51f   :  { %v296_v13 = vmul.f32 %v870_v12, %v294_v11  ;;  %vm301_vm11 = vweird.f32 %v870_v12 }
 0x520   :  { %vm302_vm13 = vmor %vm300_vm12, %vm301_vm11 }
 0x521   :  { %v297_v14 = vsub.f32 1.0, %v296_v13 }
 0x523   :  { %v298_v15 = vmul.f32 %v870_v12, %v297_v14 }
 0x525   :  { %v299_v16 = vadd.f32 %v870_v12, %v298_v15 }
 0x527   :  { %v303_v19 = vsel %vm302_vm13, %v870_v12, %v299_v16 }
 0x528   :  { %v308_v22 = vsel %vm305_vm14, %v307_v20, %v303_v19 }
 0x529   :  { %v311_v24 = vmul.f32 %v308_v22, %v258_v61  ;;  %v122_v61 = vpop.f32.mrf.mxu0 }
 0x52a   :  { %v123_v62 = vadd.f32 %v1046_v8, %v122_v61 }
 0x586   :  { %v314_v21 = vpop.permute.xlu0 %313 }
 0x587   :  { %v316_v23 = vmul.f32 %v314_v21, %v308_v22 }
 0x589   :  { %318 = vrot.lane.b32.xlu1 %v316_v23, %s914_s21 }
 0x5fb   :  { %v319_v25 = vpop.permute.xlu1 %318 }
 0x5fc   :  { %v321_v26 = vadd.f32 %v319_v25, %v311_v24  ;;  %v48_v25 = vld [vmem:[%s1245_s6 + $0x18] sm:$0xff] }
 0x5fd   :  { %837 = vmatpush.msra.mxu3 %v48_v25 }
 0x5fe   :  { %871 = vtanh.f32 %v321_v26 }
 0x604   :  { %v872_v27 = vpop.eup %871 }
 0x605   :  { %324 = vrot.lane.b32.xlu2 %v872_v27, %s913_s18  ;;  %v58_v27 = vld [vmem:[%s1241_s0 + $0x28] sm:$0xff] }
 0x606   :  { %802 = vmatmul.msk.f32.gmra.mxu0 %vm64_vm1, %v58_v27 }
 0x65f   :  { %v325_v29 = vpop.permute.xlu2 %324 }
 0x660   :  { %v327_v30 = vmul.f32 %v325_v29, %v308_v22  ;;  %v45_v29 = vld [vmem:[%s1245_s6] sm:$0xff] }
 0x662   :  { %329 = vrot.lane.b32.xlu0 %v327_v30, %s914_s21 }
 0x683   :  { %v125_v32 = vpop.f32.mrf.mxu0 }
 0x6d4   :  { %v1091_v31 = vpop.permute.xlu0 %329 }
 0x6d5   :  { %811 = vmatmul.msk.f32.vlgmr.msrb.gmra.mxu1 %vm136_vm2, %v1091_v31 }
 0x752   :  { %v350_v34 = vpop.f32.mrf.mxu1 }
 0x753   :  { %v353_v35 = vadd.f32 %v350_v34, %v120_v33  ;;  %v126_v33 = vadd.f32 %v1046_v8, %v125_v32 }
 0x755   :  { %873 = vtanh.f32 %v353_v35  ;;  %v812_v37 = vmul.f32 -1.442695, %v353_v35 }
 0x757   :  { %875 = vpow2.f32 %v812_v37 }
 0x75b   :  { %v874_v36 = vpop.eup %873 }
 0x75c   :  { %376 = vrot.lane.b32.xlu1 %v874_v36, %s913_s18 }
 0x75d   :  { %v876_v39 = vpop.eup %875 }
 0x75e   :  { %v357_v40 = vadd.f32 1.0, %v876_v39 }
 0x760   :  { %877 = vrcp.f32 %v357_v40  ;;  %v369_v46 = vand.u32 2147483648, %v357_v40  ;;  %vm363_vm0 = vweird.f32 %v357_v40  ;;  %v367_v47 = vand.u32 2147483647, %v357_v40 }
 0x762   :  { %v370_v49 = vor.u32 1.1754944e-38, %v369_v46  ;;  %vm368_vm4 = vcmp.eq.f32.partialorder %v367_v47, 8.507059e+37 }
 0x766   :  { %v878_v41 = vpop.eup %877 }
 0x767   :  { %v359_v42 = vmul.f32 %v878_v41, %v357_v40  ;;  %vm364_vm15 = vweird.f32 %v878_v41 }
 0x768   :  { %vm365_vm3 = vmor %vm363_vm0, %vm364_vm15 }
 0x769   :  { %v360_v43 = vsub.f32 1.0, %v359_v42 }
 0x76b   :  { %v361_v44 = vmul.f32 %v878_v41, %v360_v43 }
 0x76d   :  { %v362_v45 = vadd.f32 %v878_v41, %v361_v44 }
 0x76f   :  { %v366_v48 = vsel %vm365_vm3, %v878_v41, %v362_v45 }
 0x770   :  { %v371_v51 = vsel %vm368_vm4, %v370_v49, %v366_v48 }
 0x771   :  { %v374_v53 = vmul.f32 %v371_v51, %v321_v26  ;;  %v47_v26 = vld [vmem:[%s1245_s6 + $0x10] sm:$0xff]  ;;  %s915_s6 = smov 96  }
 0x772   :  { %838 = vmatpush.msra.mxu3 %v47_v26 }
 0x774   :  { %839 = vmatpush.msra.mxu3 %v46_v28 }
 0x776   :  { %840 = vmatpush.msra.mxu3 %v45_v29 }
 0x7ce   :  { %v377_v50 = vpop.permute.xlu1 %376 }
 0x7cf   :  { %v379_v52 = vmul.f32 %v377_v50, %v371_v51 }
 0x7d1   :  { %381 = vrot.lane.b32.xlu2 %v379_v52, %s914_s21 }
 0x82b   :  { %v382_v54 = vpop.permute.xlu2 %381 }
 0x82c   :  { %v384_v55 = vadd.f32 %v382_v54, %v374_v53 }
 0x82e   :  { %879 = vtanh.f32 %v384_v55 }
 0x834   :  { %v880_v56 = vpop.eup %879 }
 0x835   :  { %387 = vrot.lane.b32.xlu0 %v880_v56, %s913_s18  ;;  %v59_v56 = vld [vmem:[%s1241_s0 + $0x30] sm:$0xff] }
 0x836   :  { %803 = vmatmul.msk.f32.gmra.mxu0 %vm64_vm1, %v59_v56 }
 0x8a7   :  { %v388_v57 = vpop.permute.xlu0 %387 }
 0x8a8   :  { %v390_v58 = vmul.f32 %v388_v57, %v371_v51 }
 0x8aa   :  { %392 = vrot.lane.b32.xlu1 %v390_v58, %s914_s21 }
 0x91c   :  { %v393_v60 = vpop.permute.xlu1 %392 }
 0x91d   :  { %813 = vmatmul.msk.f32.vlgmr.msrb.gmra.mxu2 %vm136_vm2, %v393_v60 }
 0x91e   :  { %670 = vmatpush.msrb.mxu2 %v48_v25  ;;  %v51_v25 = vld [vmem:[%s1247_s8 + $0x8] sm:$0xff] }
 0x91f   :  { %749 = vmatpush.msrb.mxu1 %v51_v25 }
 0x920   :  { %671 = vmatpush.msrb.mxu2 %v47_v26  ;;  %v50_v26 = vld [vmem:[%s1247_s8] sm:$0xff] }
 0x921   :  { %750 = vmatpush.msrb.mxu1 %v50_v26 }
 0x922   :  { %672 = vmatpush.msrb.mxu2 %v46_v28 }
 0x924   :  { %673 = vmatpush.msrb.mxu2 %v45_v29 }
 0x9a0   :  { %v413_v63 = vpop.f32.mrf.mxu2 }
 0x9a1   :  { %v416_v0 = vadd.f32 %v413_v63, %v123_v62 }
 0x9a3   :  { %881 = vtanh.f32 %v416_v0  ;;  %v814_v3 = vmul.f32 -1.442695, %v416_v0 }
 0x9a5   :  { %883 = vpow2.f32 %v814_v3 }
 0x9a9   :  { %v882_v1 = vpop.eup %881 }
 0x9aa   :  { %439 = vrot.lane.b32.xlu2 %v882_v1, %s913_s18 }
 0x9ab   :  { %v884_v4 = vpop.eup %883 }
 0x9ac   :  { %v420_v5 = vadd.f32 1.0, %v884_v4 }
 0x9ae   :  { %885 = vrcp.f32 %v420_v5  ;;  %v432_v12 = vand.u32 2147483648, %v420_v5  ;;  %vm426_vm6 = vweird.f32 %v420_v5  ;;  %v430_v13 = vand.u32 2147483647, %v420_v5 }
 0x9b0   :  { %v433_v15 = vor.u32 1.1754944e-38, %v432_v12  ;;  %vm431_vm8 = vcmp.eq.f32.partialorder %v430_v13, 8.507059e+37 }
 0x9b4   :  { %v886_v6 = vpop.eup %885 }
 0x9b5   :  { %v422_v7 = vmul.f32 %v886_v6, %v420_v5  ;;  %vm427_vm5 = vweird.f32 %v886_v6 }
 0x9b6   :  { %vm428_vm7 = vmor %vm426_vm6, %vm427_vm5 }
 0x9b7   :  { %v423_v9 = vsub.f32 1.0, %v422_v7 }
 0x9b9   :  { %v424_v10 = vmul.f32 %v886_v6, %v423_v9 }
 0x9bb   :  { %v425_v11 = vadd.f32 %v886_v6, %v424_v10 }
 0x9bd   :  { %v429_v14 = vsel %vm428_vm7, %v886_v6, %v425_v11 }
 0x9be   :  { %v434_v17 = vsel %vm431_vm8, %v433_v15, %v429_v14 }
 0x9bf   :  { %v437_v19 = vmul.f32 %v434_v17, %v384_v55 }
 0xa04   :  { %v440_v16 = vpop.permute.xlu2 %439 }
 0xa05   :  { %v442_v18 = vmul.f32 %v440_v16, %v434_v17 }
 0xa07   :  { %444 = vrot.lane.b32.xlu0 %v442_v18, %s914_s21 }
 0xa79   :  { %v445_v20 = vpop.permute.xlu0 %444 }
 0xa7a   :  { %v447_v21 = vadd.f32 %v445_v20, %v437_v19 }
 0xa7c   :  { %887 = vtanh.f32 %v447_v21 }
 0xa82   :  { %v888_v22 = vpop.eup %887 }
 0xa83   :  { %450 = vrot.lane.b32.xlu1 %v888_v22, %s913_s18 }
 0xaf5   :  { %v451_v23 = vpop.permute.xlu1 %450 }
 0xaf6   :  { %v453_v24 = vmul.f32 %v451_v23, %v434_v17 }
 0xaf8   :  { %455 = vrot.lane.b32.xlu2 %v453_v24, %s914_s21  ;;  %v60_v24 = vld [vmem:[%s1241_s0 + $0x38] sm:$0xff] }
 0xaf9   :  { %804 = vmatmul.msk.f32.gmra.mxu0 %vm64_vm1, %v60_v24  ;;  %vm710_vm1 = vcmask 130048  }
 0xb52   :  { %v456_v30 = vpop.permute.xlu2 %455 }
 0xb53   :  { %815 = vmatmul.msk.f32.vlgmr.msrb.gmra.mxu3 %vm136_vm2, %v456_v30 }
 0xb5b   :  { %823 = vmatmul.msk.f32.vlgmr.msra.gmra.mxu3 %vm136_vm2, %v1091_v31 }
 0xb63   :  { %824 = vmatmul.msk.f32.gmra.mxu3 %vm136_vm2, %v393_v60  ;;  %v128_v60 = vpop.f32.mrf.mxu0 }
 0xb64   :  { %v129_v61 = vadd.f32 %v1046_v8, %v128_v60 }
 0xb6b   :  { %825 = vmatmul.msk.f32.gmra.mxu3 %vm136_vm2, %v456_v30 }
 0xbd6   :  { %v476_v34 = vpop.f32.mrf.mxu3 }
 0xbd7   :  { %v479_v35 = vadd.f32 %v476_v34, %v126_v33  ;;  %v1167_v33 = vld [vmem:[%s1246_s7] ss:$0 sm:$0xff] }
 0xbd9   :  { %889 = vtanh.f32 %v479_v35  ;;  %v816_v37 = vmul.f32 -1.442695, %v479_v35 }
 0xbdb   :  { %891 = vpow2.f32 %v816_v37 }
 0xbde   :  { %v681_v27 = vpop.f32.mrf.mxu3 }
 0xbdf   :  { %v890_v36 = vpop.eup %889 }
 0xbe0   :  { %502 = vrot.lane.b32.xlu0 %v890_v36, %s913_s18  ;;  %v131_v36 = vpop.f32.mrf.mxu0 }
 0xbe1   :  { %v892_v39 = vpop.eup %891  ;;  %v132_v37 = vadd.f32 %v1046_v8, %v131_v36 }
 0xbe2   :  { %v483_v40 = vadd.f32 1.0, %v892_v39 }
 0xbe4   :  { %893 = vrcp.f32 %v483_v40  ;;  %v495_v45 = vand.u32 2147483648, %v483_v40  ;;  %vm489_vm10 = vweird.f32 %v483_v40  ;;  %v493_v46 = vand.u32 2147483647, %v483_v40 }
 0xbe6   :  { %v496_v48 = vor.u32 1.1754944e-38, %v495_v45  ;;  %vm494_vm12 = vcmp.eq.f32.partialorder %v493_v46, 8.507059e+37  ;;  %v684_v28 = vpop.f32.mrf.mxu3 }
 0xbea   :  { %v894_v41 = vpop.eup %893 }
 0xbeb   :  { %v485_v31 = vmul.f32 %v894_v41, %v483_v40  ;;  %vm490_vm9 = vweird.f32 %v894_v41 }
 0xbec   :  { %vm491_vm11 = vmor %vm489_vm10, %vm490_vm9 }
 0xbed   :  { %v486_v42 = vsub.f32 1.0, %v485_v31 }
 0xbee   :  { %v687_v30 = vpop.f32.mrf.mxu3 }
 0xbef   :  { %v487_v43 = vmul.f32 %v894_v41, %v486_v42 }
 0xbf1   :  { %v488_v44 = vadd.f32 %v894_v41, %v487_v43 }
 0xbf3   :  { %v492_v47 = vsel %vm491_vm11, %v894_v41, %v488_v44 }
 0xbf4   :  { %v497_v50 = vsel %vm494_vm12, %v496_v48, %v492_v47  ;;  %v1184_v47 = vld [vmem:[%s1248_s9] ss:$0 sm:$0xff]  ;;  %v682_v48 = vadd.f32 %v1167_v33, %v681_v27 }
 0xbf5   :  { %v500_v52 = vmul.f32 %v497_v50, %v447_v21 }
 0xc52   :  { %v503_v49 = vpop.permute.xlu0 %502 }
 0xc53   :  { %v505_v51 = vmul.f32 %v503_v49, %v497_v50 }
 0xc55   :  { %507 = vrot.lane.b32.xlu1 %v505_v51, %s914_s21  ;;  %v701_v51 = vmax.f32 %v682_v48, 0.0 }
 0xcc7   :  { %v508_v53 = vpop.permute.xlu1 %507 }
 0xcc8   :  { %v510_v54 = vadd.f32 %v508_v53, %v500_v52  ;;  %v685_v52 = vadd.f32 %v1167_v33, %v684_v28 }
 0xcca   :  { %895 = vtanh.f32 %v510_v54  ;;  %v702_v53 = vmax.f32 %v685_v52, 0.0 }
 0xcd0   :  { %v896_v55 = vpop.eup %895 }
 0xcd1   :  { %513 = vrot.lane.b32.xlu2 %v896_v55, %s913_s18 }
 0xd2b   :  { %v514_v57 = vpop.permute.xlu2 %513 }
 0xd2c   :  { %v516_v58 = vmul.f32 %v514_v57, %v497_v50 }
 0xd2e   :  { %518 = vrot.lane.b32.xlu0 %v516_v58, %s914_s21 }
 0xda0   :  { %v519_v59 = vpop.permute.xlu0 %518 }
 0xda1   :  { %817 = vmatmul.msk.f32.vlgmr.msra.gmra.mxu1 %vm136_vm2, %v519_v59  ;;  %826 = vmatmul.msk.f32.gmra.mxu3 %vm136_vm2, %v519_v59 }
 0xe1e   :  { %v539_v62 = vpop.f32.mrf.mxu1 }
 0xe1f   :  { %v542_v63 = vadd.f32 %v539_v62, %v129_v61 }
 0xe21   :  { %897 = vtanh.f32 %v542_v63  ;;  %v818_v1 = vmul.f32 -1.442695, %v542_v63 }
 0xe23   :  { %899 = vpow2.f32 %v818_v1 }
 0xe24   :  { %v690_v32 = vpop.f32.mrf.mxu3 }
 0xe25   :  { %v691_v34 = vadd.f32 %v1167_v33, %v690_v32 }
 0xe27   :  { %v898_v0 = vpop.eup %897  ;;  %v704_v35 = vmax.f32 %v691_v34, 0.0 }
 0xe28   :  { %565 = vrot.lane.b32.xlu1 %v898_v0, %s913_s18 }
 0xe29   :  { %v900_v3 = vpop.eup %899 }
 0xe2a   :  { %v546_v4 = vadd.f32 1.0, %v900_v3 }
 0xe2c   :  { %901 = vrcp.f32 %v546_v4  ;;  %v558_v11 = vand.u32 2147483648, %v546_v4  ;;  %vm552_vm14 = vweird.f32 %v546_v4  ;;  %v556_v12 = vand.u32 2147483647, %v546_v4 }
 0xe2e   :  { %v559_v14 = vor.u32 1.1754944e-38, %v558_v11  ;;  %vm557_vm0 = vcmp.eq.f32.partialorder %v556_v12, 8.507059e+37 }
 0xe32   :  { %v902_v5 = vpop.eup %901 }
 0xe33   :  { %v548_v6 = vmul.f32 %v902_v5, %v546_v4  ;;  %vm553_vm13 = vweird.f32 %v902_v5 }
 0xe34   :  { %vm554_vm15 = vmor %vm552_vm14, %vm553_vm13 }
 0xe35   :  { %v549_v7 = vsub.f32 1.0, %v548_v6 }
 0xe37   :  { %v550_v9 = vmul.f32 %v902_v5, %v549_v7 }
 0xe39   :  { %v551_v10 = vadd.f32 %v902_v5, %v550_v9 }
 0xe3b   :  { %v555_v13 = vsel %vm554_vm15, %v902_v5, %v551_v10 }
 0xe3c   :  { %v560_v16 = vsel %vm557_vm0, %v559_v14, %v555_v13 }
 0xe3d   :  { %v563_v18 = vmul.f32 %v560_v16, %v510_v54  ;;  %v688_v54 = vadd.f32 %v1167_v33, %v687_v30 }
 0xe3f   :  { %v703_v55 = vmax.f32 %v688_v54, 0.0 }
 0xe9a   :  { %v566_v15 = vpop.permute.xlu1 %565 }
 0xe9b   :  { %v568_v17 = vmul.f32 %v566_v15, %v560_v16 }
 0xe9d   :  { %570 = vrot.lane.b32.xlu2 %v568_v17, %s914_s21 }
 0xef7   :  { %v571_v19 = vpop.permute.xlu2 %570 }
 0xef8   :  { %v1145_v20 = vadd.f32 %v571_v19, %v563_v18 }
 0xefa   :  { %903 = vtanh.f32 %v1145_v20 }
 0xf00   :  { %v904_v21 = vpop.eup %903 }
 0xf01   :  { %576 = vrot.lane.b32.xlu0 %v904_v21, %s913_s18 }
 0xf73   :  { %v577_v22 = vpop.permute.xlu0 %576 }
 0xf74   :  { %v579_v23 = vmul.f32 %v577_v22, %v560_v16 }
 0xf76   :  { %581 = vrot.lane.b32.xlu1 %v579_v23, %s914_s21 }
 0xfe8   :  { %v582_v29 = vpop.permute.xlu1 %581 }
 0xfe9   :  { %819 = vmatmul.msk.f32.vlgmr.msra.gmra.mxu2 %vm136_vm2, %v582_v29  ;;  %827 = vmatmul.msk.f32.gmra.mxu3 %vm136_vm2, %v582_v29 }
 0xfea   :  { %841 = vmatpush.msra.mxu2 %v51_v25 }
 0xfec   :  { %842 = vmatpush.msra.mxu2 %v50_v26 }
 0xff1   :  { %821 = vmatmul.msk.f32.vlgmr.msrb.gmra.mxu2 %vm136_vm2, %v1061_v38 }
 0xff9   :  { %822 = vmatmul.msk.f32.gmra.mxu2 %vm136_vm2, %v1078_v2 }
0x1001   :  { %834 = vmatmul.msk.f32.vlgmr.msra.gmra.mxu2 %vm710_vm1, %v704_v35 }
0x106c   :  { %v602_v39 = vpop.f32.mrf.mxu2  ;;  %v693_v38 = vpop.f32.mrf.mxu3 }
0x106d   :  { %v605_v40 = vadd.f32 %v602_v39, %v132_v37  ;;  %v694_v41 = vadd.f32 %v1167_v33, %v693_v38 }
0x106f   :  { %905 = vtanh.f32 %v605_v40  ;;  %v705_v31 = vmax.f32 %v694_v41, 0.0  ;;  %v820_v56 = vmul.f32 -1.442695, %v605_v40 }
0x1071   :  { %835 = vmatmul.msk.f32.gmra.mxu2 %vm710_vm1, %v705_v31  ;;  %907 = vpow2.f32 %v820_v56 }
0x1074   :  { %v675_v42 = vpop.f32.mrf.mxu2 }
0x1075   :  { %v906_v2 = vpop.eup %905  ;;  %v676_v43 = vadd.f32 %v1167_v33, %v675_v42 }
0x1076   :  { %628 = vrot.lane.b32.xlu2 %v906_v2, %s913_s18 }
0x1077   :  { %v699_v44 = vmax.f32 %v676_v43, 0.0  ;;  %v908_v57 = vpop.eup %907 }
0x1078   :  { %v609_v58 = vadd.f32 1.0, %v908_v57 }
0x1079   :  { %829 = vmatmul.msk.f32.vlgmr.msrb.gmra.mxu1 %vm710_vm1, %v699_v44 }
0x107a   :  { %909 = vrcp.f32 %v609_v58  ;;  %v621_v0 = vand.u32 2147483648, %v609_v58  ;;  %vm615_vm4 = vweird.f32 %v609_v58  ;;  %v619_v1 = vand.u32 2147483647, %v609_v58 }
0x107c   :  { %v678_v45 = vpop.f32.mrf.mxu2  ;;  %v622_v4 = vor.u32 1.1754944e-38, %v621_v0  ;;  %vm620_vm6 = vcmp.eq.f32.partialorder %v619_v1, 8.507059e+37 }
0x107d   :  { %v679_v8 = vadd.f32 %v1167_v33, %v678_v45 }
0x107f   :  { %v700_v46 = vmax.f32 %v679_v8, 0.0 }
0x1080   :  { %v910_v59 = vpop.eup %909 }
0x1081   :  { %830 = vmatmul.msk.f32.gmra.mxu1 %vm710_vm1, %v700_v46  ;;  %v611_v60 = vmul.f32 %v910_v59, %v609_v58  ;;  %vm616_vm3 = vweird.f32 %v910_v59 }
0x1082   :  { %vm617_vm5 = vmor %vm615_vm4, %vm616_vm3 }
0x1083   :  { %v612_v61 = vsub.f32 1.0, %v611_v60 }
0x1084   :  { %v767_v49 = vpop.f32.mrf.mxu2 }
0x1085   :  { %v768_v50 = vadd.f32 %v1184_v47, %v767_v49  ;;  %v613_v62 = vmul.f32 %v910_v59, %v612_v61 }
0x1087   :  { %781 = vst [vmem:[%s1249_s10 + $0x28] sm:$0xff] %v768_v50  ;;  %v614_v63 = vadd.f32 %v910_v59, %v613_v62 }
0x1089   :  { %831 = vmatmul.msk.f32.gmra.mxu1 %vm710_vm1, %v701_v51  ;;  %v618_v3 = vsel %vm617_vm5, %v910_v59, %v614_v63 }
0x108a   :  { %v623_v6 = vsel %vm620_vm6, %v622_v4, %v618_v3 }
0x108b   :  { %v626_v22 = vmul.f32 %v623_v6, %v1145_v20 }
0x1091   :  { %832 = vmatmul.msk.f32.gmra.mxu1 %vm710_vm1, %v702_v53 }
0x1099   :  { %833 = vmatmul.msk.f32.gmra.mxu1 %vm710_vm1, %v703_v55 }
0x10d0   :  { %v629_v5 = vpop.permute.xlu2 %628 }
0x10d1   :  { %v631_v7 = vmul.f32 %v629_v5, %v623_v6 }
0x10d3   :  { %633 = vrot.lane.b32.xlu0 %v631_v7, %s914_s21 }
0x10f4   :  { %v770_v9 = vpop.f32.mrf.mxu2 }
0x10f5   :  { %v771_v10 = vadd.f32 %v1184_v47, %v770_v9 }
0x10f6   :  { %v752_v11 = vpop.f32.mrf.mxu1 }
0x10f7   :  { %782 = vst [vmem:[%s1249_s10 + $0x30] sm:$0xff] %v771_v10  ;;  %v753_v12 = vadd.f32 %v1184_v47, %v752_v11 }
0x10f9   :  { %776 = vst [vmem:[%s1249_s10] sm:$0xff] %v753_v12 }
0x10fe   :  { %v755_v13 = vpop.f32.mrf.mxu1 }
0x10ff   :  { %v756_v14 = vadd.f32 %v1184_v47, %v755_v13 }
0x1101   :  { %777 = vst [vmem:[%s1249_s10 + $0x8] sm:$0xff] %v756_v14 }
0x1106   :  { %v758_v15 = vpop.f32.mrf.mxu1 }
0x1107   :  { %v759_v16 = vadd.f32 %v1184_v47, %v758_v15 }
0x1109   :  { %778 = vst [vmem:[%s1249_s10 + $0x10] sm:$0xff] %v759_v16 }
0x110e   :  { %v761_v17 = vpop.f32.mrf.mxu1 }
0x110f   :  { %v762_v18 = vadd.f32 %v1184_v47, %v761_v17 }
0x1111   :  { %779 = vst [vmem:[%s1249_s10 + $0x18] sm:$0xff] %v762_v18 }
0x1116   :  { %v764_v19 = vpop.f32.mrf.mxu1 }
0x1117   :  { %v765_v21 = vadd.f32 %v1184_v47, %v764_v19 }
0x1119   :  { %780 = vst [vmem:[%s1249_s10 + $0x20] sm:$0xff] %v765_v21 }
0x1145   :  { %v634_v23 = vpop.permute.xlu0 %633 }
0x1146   :  { %v636_v24 = vadd.f32 %v634_v23, %v626_v22 }
0x1148   :  { %911 = vtanh.f32 %v636_v24  ;;  %649 = vrot.lane.b32.xlu0 %v636_v24, %s915_s6 }
0x114e   :  { %v912_v25 = vpop.eup %911 }
0x114f   :  { %639 = vrot.lane.b32.xlu1 %v912_v25, %s913_s18 }
0x11ba   :  { %v650_v26 = vpop.permute.xlu0 %649 }
0x11bb   :  { %652 = vst.msk [vmem:[%s1250_s12] sm:$0xff] %vm136_vm2, %v650_v26 }
0x11c1   :  { %v640_v27 = vpop.permute.xlu1 %639 }
0x11c2   :  { %v642_v28 = vmul.f32 %v640_v27, %v623_v6 }
0x11c4   :  { %644 = vrot.lane.b32.xlu2 %v642_v28, %s914_s21 }
0x121e   :  { %v645_v29 = vpop.permute.xlu2 %644 }
0x121f   :  { %647 = vst.msk [vmem:[%s1251_s11] sm:$0xff] %vm136_vm2, %v645_v29  ;;  %828 = vmatmul.msk.f32.gmra.mxu3 %vm136_vm2, %v645_v29 }
0x12a2   :  { %v696_v20 = vpop.f32.mrf.mxu3 }
0x12a3   :  { %v697_v30 = vadd.f32 %v1167_v33, %v696_v20 }
0x12a5   :  { %v706_v32 = vmax.f32 %v697_v30, 0.0 }
0x12a7   :  { %836 = vmatmul.msk.f32.gmra.mxu2 %vm710_vm1, %v706_v32 }
0x132a   :  { %v773_v34 = vpop.f32.mrf.mxu2 }
0x132b   :  { %v774_v35 = vadd.f32 %v1184_v47, %v773_v34 }
0x132d   :  { %783 = vst [vmem:[%s1249_s10 + $0x38] sm:$0xff] %v774_v35 }

</bundles_post_ra>
